<compile_context>
chip_gen: v7x
topology: tpu7x:2x2x1
jax: 0.10.0
libtpu: 0.0.40
codegen_flags: <defaults>
</compile_context>

<pallas_src>
import jax
import jax.numpy as jnp
from jax.experimental import pallas as pl
from jax.experimental.pallas import tpu as pltpu


def dqn_kernel(x_ref, w1_ref, b1_ref, w2_ref, b2_ref, out_ref):
    # Cast x to the MXU dtype inside the kernel (VPU work, hidden under DMA).
    x = x_ref[...].astype(w1_ref.dtype)
    # h = relu(x @ W1 + b1): bf16 matmul, f32 accumulate, f32 elementwise.
    h = jnp.dot(x, w1_ref[...], preferred_element_type=jnp.float32)
    h = jnp.maximum(h + b1_ref[...], 0.0)
    # q = h @ W2 + b2: re-narrow h for the MXU, accumulate in f32.
    q = jnp.dot(h.astype(w2_ref.dtype), w2_ref[...],
                preferred_element_type=jnp.float32)
    out_ref[...] = (q + b2_ref[...]).astype(out_ref.dtype)


def dqn_forward(x, w1, b1, w2, b2, *, block_b=1024,
                compute_dtype=jnp.bfloat16):
    """x: (B, num_obs) f32. w1: (num_obs, 128), b1: (128,),
    w2: (128, num_actions), b2: (num_actions,).
    Returns (B, num_actions) f32 Q-values."""
    B, num_obs = x.shape
    hidden = w1.shape[1]
    num_actions = w2.shape[1]

    # Batch tile: multiple of 8, large enough to amortize per-step overhead,
    # capped at ~half the batch so the "parallel" grid has >= 2 steps (lets
    # v7x split across its two TensorCores).  No explicit padding of x: the
    # grid over-covers B and Pallas masks the partial final block.
    half = pl.cdiv(B, 2)
    tb = min(block_b, max(8, pl.cdiv(half, 8) * 8))
    grid_b = pl.cdiv(B, tb)

    # Tiny (~10 KB) weight prep; when jitted with loop-invariant params XLA
    # hoists/constant-folds these casts out of the hot path.
    w1_c = w1.astype(compute_dtype)
    w2_c = w2.astype(compute_dtype)
    b1_c = b1.reshape(1, hidden).astype(jnp.float32)
    b2_c = b2.reshape(1, num_actions).astype(jnp.float32)

    out = pl.pallas_call(
        dqn_kernel,
        out_shape=jax.ShapeDtypeStruct((B, num_actions), jnp.float32),
        grid=(grid_b,),
        in_specs=[
            # streamed x tiles (last dim == full array dim -> legal block)
            pl.BlockSpec((tb, num_obs), lambda i: (i, 0)),
            # VMEM-resident weights/biases (constant index maps)
            pl.BlockSpec((num_obs, hidden), lambda i: (0, 0)),
            pl.BlockSpec((1, hidden), lambda i: (0, 0)),
            pl.BlockSpec((hidden, num_actions), lambda i: (0, 0)),
            pl.BlockSpec((1, num_actions), lambda i: (0, 0)),
        ],
        # narrow output block: last dim == full out dim, tb multiple of 8
        out_specs=pl.BlockSpec((tb, num_actions), lambda i: (i, 0)),
        compiler_params=pltpu.CompilerParams(
            dimension_semantics=("parallel",)),
    )(x, w1_c, b1_c, w2_c, b2_c)

    return out


def init_params(key, num_obs, num_actions, hidden=128):
    """Deterministic init mimicking PyTorch nn.Linear default U(-1/sqrt(fan_in), +)."""
    k1, k2, k3, k4 = jax.random.split(key, 4)
    bound1 = 1.0 / jnp.sqrt(num_obs)
    bound2 = 1.0 / jnp.sqrt(hidden)
    w1 = jax.random.uniform(k1, (num_obs, hidden), jnp.float32, -bound1, bound1)
    b1 = jax.random.uniform(k2, (hidden,), jnp.float32, -bound1, bound1)
    w2 = jax.random.uniform(k3, (hidden, num_actions), jnp.float32, -bound2, bound2)
    b2 = jax.random.uniform(k4, (num_actions,), jnp.float32, -bound2, bound2)
    return w1, b1, w2, b2


if __name__ == "__main__":
    num_obs = 16
    num_actions = 4
    batch = 100   # exercises 2 grid steps (tb=56) + masked partial final block

    key = jax.random.PRNGKey(0)
    kx, kp = jax.random.split(key)
    x = jax.random.normal(kx, (batch, num_obs), jnp.float32)
    w1, b1, w2, b2 = init_params(kp, num_obs, num_actions)

    q = dqn_forward(x, w1, b1, w2, b2)
    q = jax.block_until_ready(q)

    # Pure-JAX reference with matching bf16 quantization of x/W1/h/W2
    # (accumulation and elementwise in f32, like the kernel).
    xb = x.astype(jnp.bfloat16).astype(jnp.float32)
    w1b = w1.astype(jnp.bfloat16).astype(jnp.float32)
    w2b = w2.astype(jnp.bfloat16).astype(jnp.float32)
    h_ref = jnp.maximum(xb @ w1b + b1, 0.0)
    ref = h_ref.astype(jnp.bfloat16).astype(jnp.float32) @ w2b + b2

    assert q.shape == (batch, num_actions)
    assert jnp.allclose(q, ref, atol=1e-2, rtol=1e-2), "mismatch vs reference"

    print("KERNEL_OK")
</pallas_src>

<mosaic_0001>
module attributes {stable_mosaic.version = 11 : i64} {
  func.func @dqn_kernel(%arg0: i32, %arg1: memref<56x16xf32, #tpu.memory_space<vmem>>, %arg2: memref<16x128xbf16, #tpu.memory_space<vmem>>, %arg3: memref<1x128xf32, #tpu.memory_space<vmem>>, %arg4: memref<128x4xbf16, #tpu.memory_space<vmem>>, %arg5: memref<1x4xf32, #tpu.memory_space<vmem>>, %arg6: memref<56x4xf32, #tpu.memory_space<vmem>>) attributes {dimension_semantics = [#tpu.dimension_semantics<parallel>], iteration_bounds = array<i64: 2>, scalar_prefetch = 0 : i64, scratch_operands = 0 : i64, tpu.core_type = #tpu.core_type<tc>, window_params = [{transform_indices = @transform_0, window_bounds = array<i64: 56, 16>}, {pipeline_mode = #tpu.pipeline_mode<synchronous>, transform_indices = @transform_1, window_bounds = array<i64: 16, 128>}, {pipeline_mode = #tpu.pipeline_mode<synchronous>, transform_indices = @transform_2, window_bounds = array<i64: 1, 128>}, {pipeline_mode = #tpu.pipeline_mode<synchronous>, transform_indices = @transform_3, window_bounds = array<i64: 128, 4>}, {pipeline_mode = #tpu.pipeline_mode<synchronous>, transform_indices = @transform_4, window_bounds = array<i64: 1, 4>}, {transform_indices = @transform_5, window_bounds = array<i64: 56, 4>}]} {
    %c0 = arith.constant 0 : index
    %c0_0 = arith.constant 0 : index
    %0 = vector.load %arg1[%c0, %c0_0] : memref<56x16xf32, #tpu.memory_space<vmem>>, vector<56x16xf32>
    %1 = arith.truncf %0 : vector<56x16xf32> to vector<56x16xbf16>
    %c0_1 = arith.constant 0 : index
    %c0_2 = arith.constant 0 : index
    %2 = vector.load %arg2[%c0_1, %c0_2] : memref<16x128xbf16, #tpu.memory_space<vmem>>, vector<16x128xbf16>
    %cst = arith.constant dense<0.000000e+00> : vector<56x128xf32>
    %3 = tpu.matmul %1, %2, %cst {dimension_numbers = #tpu.dot_dimension_numbers<[1], [0], [0], [1], [0, 0, 1, 1], [], []>} : vector<56x16xbf16>, vector<16x128xbf16>, vector<56x128xf32> -> vector<56x128xf32>
    %c0_3 = arith.constant 0 : index
    %c0_4 = arith.constant 0 : index
    %4 = vector.load %arg3[%c0_3, %c0_4] : memref<1x128xf32, #tpu.memory_space<vmem>>, vector<1x128xf32>
    %5 = vector.broadcast %4 : vector<1x128xf32> to vector<56x128xf32>
    %6 = arith.addf %3, %5 : vector<56x128xf32>
    %cst_5 = arith.constant 0.000000e+00 : f32
    %7 = vector.broadcast %cst_5 : f32 to vector<56x128xf32>
    %8 = arith.maximumf %6, %7 : vector<56x128xf32>
    %9 = arith.truncf %8 : vector<56x128xf32> to vector<56x128xbf16>
    %c0_6 = arith.constant 0 : index
    %c0_7 = arith.constant 0 : index
    %10 = vector.load %arg4[%c0_6, %c0_7] : memref<128x4xbf16, #tpu.memory_space<vmem>>, vector<128x4xbf16>
    %cst_8 = arith.constant dense<0.000000e+00> : vector<56x4xf32>
    %11 = tpu.matmul %9, %10, %cst_8 {dimension_numbers = #tpu.dot_dimension_numbers<[1], [0], [0], [1], [0, 0, 1, 1], [], []>} : vector<56x128xbf16>, vector<128x4xbf16>, vector<56x4xf32> -> vector<56x4xf32>
    %c0_9 = arith.constant 0 : index
    %c0_10 = arith.constant 0 : index
    %12 = vector.load %arg5[%c0_9, %c0_10] : memref<1x4xf32, #tpu.memory_space<vmem>>, vector<1x4xf32>
    %13 = vector.broadcast %12 : vector<1x4xf32> to vector<56x4xf32>
    %14 = arith.addf %11, %13 : vector<56x4xf32>
    %c0_11 = arith.constant 0 : index
    %c0_12 = arith.constant 0 : index
    %15 = vector.load %arg6[%c0_11, %c0_12] : memref<56x4xf32, #tpu.memory_space<vmem>>, vector<56x4xf32>
    tpu.vector_store %arg6[%c0_11, %c0_12], %14 {strides = array<i32>} : memref<56x4xf32, #tpu.memory_space<vmem>>, vector<56x4xf32>,
    return
  }
  func.func @transform_0(%arg0: i32) -> (i32, i32) {
    %c0_i32 = arith.constant 0 : i32
    %c0_i32_0 = arith.constant 0 : i32
    return %arg0, %c0_i32 : i32, i32
  }
  func.func @transform_1(%arg0: i32) -> (i32, i32) {
    %c0_i32 = arith.constant 0 : i32
    %c0_i32_0 = arith.constant 0 : i32
    %c0_i32_1 = arith.constant 0 : i32
    return %c0_i32, %c0_i32_0 : i32, i32
  }
  func.func @transform_2(%arg0: i32) -> (i32, i32) {
    %c0_i32 = arith.constant 0 : i32
    %c0_i32_0 = arith.constant 0 : i32
    %c0_i32_1 = arith.constant 0 : i32
    return %c0_i32, %c0_i32_0 : i32, i32
  }
  func.func @transform_3(%arg0: i32) -> (i32, i32) {
    %c0_i32 = arith.constant 0 : i32
    %c0_i32_0 = arith.constant 0 : i32
    %c0_i32_1 = arith.constant 0 : i32
    return %c0_i32, %c0_i32_0 : i32, i32
  }
  func.func @transform_4(%arg0: i32) -> (i32, i32) {
    %c0_i32 = arith.constant 0 : i32
    %c0_i32_0 = arith.constant 0 : i32
    %c0_i32_1 = arith.constant 0 : i32
    return %c0_i32, %c0_i32_0 : i32, i32
  }
  func.func @transform_5(%arg0: i32) -> (i32, i32) {
    %c0_i32 = arith.constant 0 : i32
    %c0_i32_0 = arith.constant 0 : i32
    return %arg0, %c0_i32 : i32, i32
  }
}

</mosaic_0001>

<bundles_post_ra>
// kernel: tpu_custom_call.1
= control target key start
LH: loop header
LB: loop body
LE: loop exit
PB: predicated region body
PF: predicated region fallthrough
CT: control target
= control target key end

     0   :  { %s1066_s18 = smov 0   ;;  %s1068_s19 = smov 0   ;;  %s1213_s0 = inlined_call_operand.vmem [shape: f32[100,16], index: 0, kind: input, shape index: {}]   ;;  %s1214_s1 = inlined_call_operand.vmem [shape: bf16[16,128], index: 1, kind: input, shape index: {}]   ;;  %s1215_s2 = inlined_call_operand.vmem [shape: f32[1,128], index: 2, kind: input, shape index: {}]   ;;  %s1216_s3 = inlined_call_operand.vmem [shape: bf16[128,4], index: 3, kind: input, shape index: {}]   ;;  %s1217_s4 = inlined_call_operand.vmem [shape: f32[1,4], index: 4, kind: input, shape index: {}]   ;;  %s1218_s5 = inlined_call_operand.vmem [shape: f32[100,4], index: 5, kind: output, shape index: {}]  }
   0x1   :  { %s1070_s20 = smov 0  }
   0x2 LB: > { %s1079_s21 = sadd.s32 4294967295, %s1002_s20   ;;  %s1081_s22 = sadd.s32 1, %s1002_s20   ;;  %s1002_s20 = sphi %s1070_s20, %s1225_s20   ;;  %s998_s19 = sphi %s1068_s19, %s1224_s19   ;;  %s994_s18 = sphi %s1066_s18, %s1223_s18  }
   0x3   : > { %s129_s23 = ssub.s32 %s1002_s20, %s1081_s22  ;;  %s132_s24 = sadd.s32 1, %s998_s19 }
   0x4   : > { %p130_p0 = scmp.eq.s32.totalorder %s129_s23, 0  ;;  %p142_p1 = scmp.ne.s32.totalorder %s998_s19, %s994_s18 }
   0x5   : > { %p143_p2 = scmp.eq.s32.totalorder %s1079_s21, 1  ;;  %p748_p3 = scmp.ge.s32.totalorder %s1002_s20, 1 }
   0x6   : > { %s1089_s25 = scalar_select %p130_p0, %s998_s19, %s132_s24  }
   0x7   : > { %p1091_p4 = por %p143_p2, %p142_p1  ;;  %p196_p5 = scmp.lt.s32.totalorder %s1002_s20, 3 }
   0x9   : > { %p197_p6 = pnand %p748_p3, %p196_p5 }
   0xa   : > { %v935_v0 = vld [vmem:[%s1214_s1] sm:$0xff] (!%p197_p6)   ;;  %s1099_s29 = smul.u32 (!%p197_p6), 7, %s1079_s21  ;;  %v937_v2 = vld [vmem:[%s1216_s3 + $0x8] sm:$0xff] (!%p197_p6)   ;;  %v938_v3 = vld [vmem:[%s1216_s3 + $0x10] sm:$0xff] (!%p197_p6)   ;;  %vm273_vm0 = vcmask (!%p197_p6), 130048   ;;  %vm496_vm1 = vcmask (!%p197_p6), 31744  }
   0xb   : > { %200 = sbr.rel (%p197_p6) target bundleno = 535 (0x217), region = 40  ;;  %v936_v1 = vld [vmem:[%s1216_s3] sm:$0xff] (!%p197_p6)   ;;  %795 = vmatprep.subr.bf16.mxu0 (!%p197_p6), %v935_v0  ;;  %v939_v13 = vld [vmem:[%s1216_s3 + $0x18] sm:$0xff] (!%p197_p6)   ;;  %v941_v17 = vld [vmem:[%s1216_s3 + $0x28] sm:$0xff] (!%p197_p6)  }
   0xc   : > { %p232_p7 = scmp.lt.s32.totalorder (!%p197_p6), %s1099_s29, 12  ;;  %796 = vmatpush3.bf16.msra.mxu0 (!%p197_p6), %v935_v0  ;;  %829 = vmatprep.subr.bf16.mxu1 (!%p197_p6), %v936_v1  ;;  %v940_v15 = vld [vmem:[%s1216_s3 + $0x20] sm:$0xff] (!%p197_p6)   ;;  %v942_v18 = vld [vmem:[%s1216_s3 + $0x30] sm:$0xff] (!%p197_p6)   ;;  %v943_v19 = vld [vmem:[%s1216_s3 + $0x38] sm:$0xff] (!%p197_p6)  }
   0xd   : > { %805 = vmatprep.subr.bf16.mxu0 (!%p197_p6), %v936_v1  ;;  %837 = vmatpush3.bf16.msra.mxu1 (!%p197_p6), %v936_v1  ;;  %v750_v20 = vld [vmem:[%s1215_s2] ss:$0 sm:$0xff] (!%p197_p6) }
   0xe   : > { %830 = vmatprep.subr.bf16.mxu1 (!%p197_p6), %v937_v2  ;;  %v756_v47 = vld [vmem:[%s1217_s4] ss:$0 sm:$0xff] (!%p197_p6) }
  0x11   : > { %838 = vmatpush3.bf16.msra.mxu1 (!%p197_p6), %v937_v2 }
  0x12   : > { %s233_s9 = scalar_select %p232_p7, %s1099_s29, 12  ;;  %831 = vmatprep.subr.bf16.mxu1 %v938_v3 }
  0x14   : > { %s749_s10 = sshll.u32 %s233_s9, 3 }
  0x15   : > { %s235_s15 = scalar_lea.vmem %s1213_s0, %s749_s10  ;;  %839 = vmatpush3.bf16.msra.mxu1 %v938_v3  ;;  %s224_s10 = sand.u32 1, %s994_s18  }
  0x16   : > { %v247_v4 = vld [vmem:[%s235_s15] sm:$0xff]  ;;  %v248_v5 = vld [vmem:[%s235_s15 + $0x8] sm:$0xff]  ;;  %v249_v6 = vld [vmem:[%s235_s15 + $0x10] sm:$0xff]  ;;  %832 = vmatprep.subr.bf16.mxu1 %v939_v13  ;;  %s845_s11 = smul.u32 56, %s224_s10  ;;  %s512_s18 = ssub.s32 (%p1091_p4), 13, %s1099_s29 }
  0x17   : > { %v254_v7 = vpack.c.bf16 %v248_v5, %v247_v4  ;;  %v250_v8 = vld [vmem:[%s235_s15 + $0x18] sm:$0xff]  ;;  %v251_v9 = vld [vmem:[%s235_s15 + $0x20] sm:$0xff]  ;;  %v252_v10 = vld [vmem:[%s235_s15 + $0x28] sm:$0xff]  ;;  %p513_p8 = scmp.lt.s32.totalorder (%p1091_p4), %s512_s18, 7 }
  0x18   : > { %v255_v11 = vpack.c.bf16 %v250_v8, %v249_v6  ;;  %v256_v12 = vpack.c.bf16 %v252_v10, %v251_v9  ;;  %v253_v14 = vld [vmem:[%s235_s15 + $0x30] sm:$0xff]  ;;  %s1141_s14 = scalar_lea.vmem [#allocation2], %s845_s11   ;;  %s777_s15 = smul.u32 (%p1091_p4), 56, %s1079_s21 }
  0x19   : > { %797 = vmatprep.mubr.msk.bf16.mxu0 %vm273_vm0, %v254_v7  ;;  %v257_v16 = vpack.c.bf16 %v253_v14, %v253_v14  ;;  %840 = vmatpush3.bf16.msra.mxu1 %v939_v13 }
  0x1a   : > { %798 = vmatmul.mubr.msk.bf16.vlgmr.msra.gmra.mrb[0].mxu0 %vm273_vm0, %v255_v11  ;;  %833 = vmatprep.subr.bf16.mxu1 %v940_v15  ;;  %s1164_s20 = scalar_lea.vmem (%p1091_p4), %s1218_s5, %s777_s15  }
  0x1b   : > { %801 = vmatprep.mubr.msk.bf16.mxu0 %vm273_vm0, %v256_v12  ;;  %806 = vmatpush3.bf16.msra.mxu0 %v936_v1 }
  0x1c   : > { %807 = vmatprep.subr.bf16.mxu0 %v937_v2 }
  0x1d   : > { %841 = vmatpush3.bf16.msra.mxu1 %v940_v15 }
  0x1e   : > { %834 = vmatprep.subr.bf16.mxu1 %v941_v17 }
  0x1f   : > { %808 = vmatpush3.bf16.msra.mxu0 %v937_v2 }
  0x20   : > { %809 = vmatprep.subr.bf16.mxu0 %v938_v3 }
  0x21   : > { %842 = vmatpush3.bf16.msra.mxu1 %v941_v17 }
  0x22   : > { %802 = vmatmul.mubr.msk.bf16.gmra.mrb[4].mxu0 %vm273_vm0, %v257_v16  ;;  %835 = vmatprep.subr.bf16.mxu1 %v942_v18 }
  0x23   : > { %810 = vmatpush3.bf16.msra.mxu0 %v938_v3 }
  0x24   : > { %811 = vmatprep.subr.bf16.mxu0 %v939_v13 }
  0x25   : > { %843 = vmatpush3.bf16.msra.mxu1 %v942_v18 }
  0x26   : > { %836 = vmatprep.subr.bf16.mxu1 %v943_v19 }
  0x27   : > { %812 = vmatpush3.bf16.msra.mxu0 %v939_v13 }
  0x28   : > { %813 = vmatprep.subr.bf16.mxu0 %v940_v15 }
  0x29   : > { %844 = vmatpush3.bf16.msra.mxu1 %v943_v19 }
  0x2b   : > { %814 = vmatpush3.bf16.msra.mxu0 %v940_v15 }
  0x2c   : > { %815 = vmatprep.subr.bf16.mxu0 %v941_v17 }
  0x2f   : > { %816 = vmatpush3.bf16.msra.mxu0 %v941_v17 }
  0x30   : > { %817 = vmatprep.subr.bf16.mxu0 %v942_v18 }
  0x33   : > { %818 = vmatpush3.bf16.msra.mxu0 %v942_v18 }
  0x34   : > { %819 = vmatprep.subr.bf16.mxu0 %v943_v19 }
  0x37   : > { %820 = vmatpush3.bf16.msra.mxu0 %v943_v19 }
  0xed   : > { %v799_v21 = vpop.f32.mrb[0].mxu0 }
  0xee   : > { %v329_v22 = vadd.f32 %v799_v21, %v750_v20  ;;  %v320_v23 = vpop.f32.mrb[1].mxu0 }
  0xef   : > { %v321_v24 = vadd.f32 %v750_v20, %v320_v23  ;;  %v800_v25 = vpop.f32.mrb[2].mxu0 }
  0xf0   : > { %v332_v26 = vadd.f32 %v800_v25, %v750_v20  ;;  %v323_v27 = vpop.f32.mrb[3].mxu0  ;;  %v352_v29 = vmax.f32 %v329_v22, 0.0 }
  0xf1   : > { %v324_v28 = vadd.f32 %v750_v20, %v323_v27  ;;  %v350_v31 = vmax.f32 %v321_v24, 0.0 }
  0xf2   : > { %v353_v30 = vmax.f32 %v332_v26, 0.0 }
  0xf3   : > { %v351_v32 = vmax.f32 %v324_v28, 0.0 }
  0xf4   : > { %v358_v33 = vpack.c.bf16 %v353_v30, %v352_v29 }
  0xf5   : > { %v357_v34 = vpack.c.bf16 %v351_v32, %v350_v31  ;;  %v803_v35 = vpop.f32.mrb[4].mxu0 }
  0xf6   : > { %v345_v36 = vadd.f32 %v803_v35, %v750_v20  ;;  %v336_v37 = vpop.f32.mrb[5].mxu0 }
  0xf7   : > { %v337_v38 = vadd.f32 %v750_v20, %v336_v37  ;;  %v804_v39 = vpop.f32.mrb[6].mxu0  ;;  %821 = vmatprep.mubr.bf16.mxu0 %v357_v34 }
  0xf8   : > { %v339_v40 = vpop.f32.mrb[7].mxu0  ;;  %822 = vmatmul.mubr.bf16.vlgmr.msra.gmra.mrb[8].mxu0 %v358_v33  ;;  %v356_v42 = vmax.f32 %v345_v36, 0.0 }
  0xf9   : > { %v340_v41 = vadd.f32 %v750_v20, %v339_v40  ;;  %v354_v43 = vmax.f32 %v337_v38, 0.0 }
  0xfa   : > { %v360_v46 = vpack.c.bf16 %v356_v42, %v356_v42 }
  0xfb   : > { %v355_v44 = vmax.f32 %v340_v41, 0.0 }
  0xfd   : > { %v359_v45 = vpack.c.bf16 %v355_v44, %v354_v43 }
  0xff   : > { %825 = vmatprep.mubr.bf16.mxu1 %v359_v45 }
 0x100   : > { %826 = vmatmul.mubr.bf16.vlgmr.msra.gmra.mrb[0].mxu1 %v360_v46 }
 0x1cb   : > { %v823_v48 = vpop.f32.mrb[8].mxu0 }
 0x1cc   : > { %v475_v49 = vadd.f32 %v823_v48, %v756_v47  ;;  %v466_v50 = vpop.f32.mrb[9].mxu0 }
 0x1cd   : > { %v467_v51 = vadd.f32 %v756_v47, %v466_v50  ;;  %v824_v52 = vpop.f32.mrb[10].mxu0 }
 0x1ce   : > { %499 = vst.msk [vmem:[%s1141_s14 + $0x10] sm:$0xff] %vm496_vm1, %v475_v49  ;;  %v478_v53 = vadd.f32 %v824_v52, %v756_v47  ;;  %v469_v54 = vpop.f32.mrb[11].mxu0 }
 0x1cf   : > { %497 = vst.msk [vmem:[%s1141_s14] sm:$0xff] %vm496_vm1, %v467_v51  ;;  %v470_v55 = vadd.f32 %v756_v47, %v469_v54 }
 0x1d0   : > { %500 = vst.msk [vmem:[%s1141_s14 + $0x18] sm:$0xff] %vm496_vm1, %v478_v53 }
 0x1d1   : > { %498 = vst.msk [vmem:[%s1141_s14 + $0x8] sm:$0xff] %vm496_vm1, %v470_v55 }
 0x1d3   : > { %v827_v56 = vpop.f32.mrb[0].mxu1  ;;  %510 = sbr.rel (!%p1091_p4) target bundleno = 535 (0x217), region = 44 }
 0x1d4   : > { %v491_v57 = vadd.f32 %v827_v56, %v756_v47  ;;  %v482_v58 = vpop.f32.mrb[1].mxu1 }
 0x1d5   : > { %v483_v59 = vadd.f32 %v756_v47, %v482_v58  ;;  %v828_v60 = vpop.f32.mrb[2].mxu1 }
 0x1d6   : > { %503 = vst.msk [vmem:[%s1141_s14 + $0x30] sm:$0xff] %vm496_vm1, %v491_v57  ;;  %v485_v61 = vpop.f32.mrb[3].mxu1 }
 0x1d7   : > { %501 = vst.msk [vmem:[%s1141_s14 + $0x20] sm:$0xff] %vm496_vm1, %v483_v59  ;;  %v486_v62 = vadd.f32 %v756_v47, %v485_v61 }
 0x1d9   : > { %502 = vst.msk [vmem:[%s1141_s14 + $0x28] sm:$0xff] %vm496_vm1, %v486_v62 }
 0x1da   : > { %s1227_s18 = smov (!%p513_p8, %s512_s18), 7 }
 0x1db   : > { %s765_s23 = sshll.u32 %s1227_s18, 7 }
 0x1dc   : > { %p768_p9 = scmp.eq.s32.totalorder %s765_s23, 0 }
 0x1dd   : > { %944 = sdivrem.u32 (!%p768_p9), %s1227_s18, 7 }
 0x1de   : > { %521 = sbr.rel (%p768_p9) target bundleno = 535 (0x217), region = 48 }
 0x1e6   : > { %s1170_s26 = spop.drf %944 }
 0x1e7   : > { %p769_p10 = scmp.le.s32.totalorder %s1170_s26, 0 }
 0x1e8   : > { %s1220_s21 = smov (!%p769_p10), %s1164_s20  ;;  %s1221_s29 = smov (!%p769_p10), %s1141_s14 }
 0x1e9   : > { %701 = sbr.rel (%p769_p10) target bundleno = 506 (0x1fa), region = 124  ;;  %s1179_s24 = smov (!%p769_p10), 0  }
 0x1ea   : > { %s1181_s27 = smov (!%p769_p10), 0  }
 0x1f0 LB: >> { %v597_v63 = vld [vmem:[%s1010_s29] sm:$0xff]  ;;  %v599_v0 = vld [vmem:[%s1010_s29 + $0x8] sm:$0xff]  ;;  %v601_v1 = vld [vmem:[%s1010_s29 + $0x10] sm:$0xff]  ;;  %s611_s28 = sadd.s32 1, %s1014_s24  ;;  %s591_s27 = sadd.s32 1, %s1018_s27   ;;  %s1018_s27 = sphi %s1181_s27, %s591_s27   ;;  %s1014_s24 = sphi %s1179_s24, %s1222_s24   ;;  %s1010_s29 = sphi %s1221_s29, %s616_s29   ;;  %s1006_s21 = sphi %s1220_s21, %s617_s21  }
 0x1f1   : >> { %598 = vst [vmem:[%s1006_s21] sm:$0xff] %v597_v63  ;;  %600 = vst [vmem:[%s1006_s21 + $0x8] sm:$0xff] %v599_v0  ;;  %v603_v2 = vld [vmem:[%s1010_s29 + $0x18] sm:$0xff]  ;;  %v605_v3 = vld [vmem:[%s1010_s29 + $0x20] sm:$0xff]  ;;  %p612_p11 = scmp.ge.s32.totalorder %s611_s28, %s1170_s26  ;;  %p590_p12 = scmp.ge.s32.totalorder %s591_s27, %s1170_s26 }
 0x1f2   : >> { %602 = vst [vmem:[%s1006_s21 + $0x10] sm:$0xff] %v601_v1  ;;  %v607_v4 = vld [vmem:[%s1010_s29 + $0x28] sm:$0xff]  ;;  %604 = vst [vmem:[%s1006_s21 + $0x18] sm:$0xff] %v603_v2  ;;  %v609_v5 = vld [vmem:[%s1010_s29 + $0x30] sm:$0xff] }
 0x1f3   : >> { %606 = vst [vmem:[%s1006_s21 + $0x20] sm:$0xff] %v605_v3  ;;  %608 = vst [vmem:[%s1006_s21 + $0x28] sm:$0xff] %v607_v4  ;;  %s1229_s28 = smov (%p612_p11, %s611_s28), 0  ;;  %593 = sbr.rel (!%p590_p12) target bundleno = 496 (0x1f0), region = 130 }
 0x1f4   : >> { %610 = vst [vmem:[%s1006_s21 + $0x30] sm:$0xff] %v609_v5  ;;  %s614_s30 = smul.u32 56, %s1229_s28  ;;  %s1222_s24 = smov %s1229_s28 }
 0x1f6   : >> { %s616_s29 = scalar_lea.vmem %s1141_s14, %s614_s30 [#allocation2]   ;;  %s617_s21 = scalar_lea.vmem %s1164_s20, %s614_s30  }
 0x1fa PF: > { %946 = sdivrem.u32 %s1227_s18, 7 }
 0x1fb   : > { %s770_s6 = smul.u32 56, %s1170_s26 }
 0x1fd   : > { %s622_s7 = scalar_lea.vmem %s1141_s14, %s770_s6 [#allocation2]   ;;  %s624_s8 = scalar_lea.vmem %s1164_s20, %s770_s6  }
 0x203   : > { %s947_s9 = spop.drf %946 }
 0x204   : > { %p772_p13 = scmp.le.s32.totalorder %s947_s9, 0 }
 0x205   : > { %s1020_s10 = smov (!%p772_p13), %s624_s8   ;;  %s1024_s11 = smov (!%p772_p13), %s622_s7  }
 0x206   : > { %715 = sbr.rel (%p772_p13) target bundleno = 535 (0x217), region = 135  ;;  %s1028_s12 = smov (!%p772_p13), 0  }
 0x207   : > { %s1032_s13 = smov (!%p772_p13), 0  }
 0x20d LB: >> { %v634_v6 = vld [vmem:[%s1026_s11] sm:$0xff]  ;;  %s636_s15 = sadd.s32 1, %s1030_s12  ;;  %s628_s13 = sadd.s32 1, %s1034_s13   ;;  %s1034_s13 = sphi %s1032_s13, %s628_s13   ;;  %s1030_s12 = sphi %s1028_s12, %s1029_s12   ;;  %s1026_s11 = sphi %s1024_s11, %s641_s11   ;;  %s1022_s10 = sphi %s1020_s10, %s642_s10  }
 0x20e   : >> { %635 = vst [vmem:[%s1022_s10] sm:$0xff] %v634_v6  ;;  %p637_p0 = scmp.ge.s32.totalorder %s636_s15, %s947_s9  ;;  %p627_p1 = scmp.ge.s32.totalorder %s628_s13, %s947_s9 }
 0x210   : >> { %s1231_s15 = smov (%p637_p0, %s636_s15), 0  ;;  %630 = sbr.rel (!%p627_p1) target bundleno = 525 (0x20d), region = 141 }
 0x211   : >> { %s773_s14 = sshll.u32 %s1231_s15, 3  ;;  %s1029_s12 = smov %s1231_s15  }
 0x212   : >> { %s641_s11 = scalar_lea.vmem %s622_s7, %s773_s14 [#allocation2]   ;;  %s642_s10 = scalar_lea.vmem %s624_s8, %s773_s14  }
 0x217 PF: > { %p12_p2 = scmp.ge.s32.totalorder %s1081_s22, 4   ;;  %s1223_s18 = smov %s998_s19 }
 0x218   : > { %s1224_s19 = smov %s1089_s25  ;;  %s1225_s20 = smov %s1081_s22 }
 0x219   :  { %14 = sbr.rel (!%p12_p2) target bundleno = 2 (0x2), region = 152 }

</bundles_post_ra>
